<compile_context>
chip_gen: v6e
topology: v6e:2x2x1
jax: 0.10.0
libtpu: 0.0.40
codegen_flags: <defaults>
</compile_context>

<pallas_src>
import functools

import jax
import jax.numpy as jnp
from jax.experimental import pallas as pl
from jax.experimental.pallas import tpu as pltpu

LANES = 128      # vreg lane width
SUBLANES = 8     # vreg sublane count


def _linear_kernel(x_ref, s_ref, b_ref, o_ref):
    # x_ref: VMEM (TR, IN_F*128)  -- feature-interleaved rows, fully dense
    # s_ref: VMEM (IN_F*128, 128) -- weighted de-interleave matrix (resident)
    # b_ref: SMEM (1,)            -- scalar bias
    # o_ref: VMEM (TR, 128)       -- 128 outputs per sublane row, fully dense
    o_ref[...] = (
        jnp.dot(
            x_ref[...],
            s_ref[...],
            preferred_element_type=jnp.float32,
            precision=jax.lax.Precision.HIGHEST,
        )
        + b_ref[0]
    )


@functools.partial(jax.jit, static_argnames=("block_rows",))
def output_layer_nos(x, weight, bias, *, block_rows=1024):
    """x: (N, 3) f32, weight: (1, 3) f32, bias: (1,) f32 -> (N, 1) f32."""
    n, in_f = x.shape
    assert weight.shape == (1, in_f), weight.shape
    assert bias.shape == (1,), bias.shape
    if n == 0:  # degenerate empty batch
        return jnp.zeros((0, 1), jnp.float32)

    x = x.astype(jnp.float32)
    w_flat = weight.reshape(in_f).astype(jnp.float32)
    b_flat = bias.reshape(1).astype(jnp.float32)

    width = in_f * LANES               # lanes of one row of the dense view
    row_quant = SUBLANES * LANES       # 1024 input rows -> one full (8,128) tile
    n_pad = row_quant * pl.cdiv(n, row_quant)
    xp = x if n_pad == n else jnp.pad(x, ((0, n_pad - n), (0, 0)))

    r = n_pad // LANES                 # sublane rows of the dense view (mult of 8)
    xr = xp.reshape(r, width)          # FREE reshape: contiguous, no data movement

    tr = min(block_rows, r)            # block rows; both are multiples of 8
    grid = (pl.cdiv(r, tr),)

    # Weighted de-interleave matrix: S[c, j] = w[c % in_f] iff c // in_f == j.
    # (out[q, j] = sum_f w[f] * x[128*q + j, f]  ==  x @ W.T for row 128*q+j.)
    c_idx = jnp.arange(width)
    sel = (c_idx[:, None] // in_f) == jnp.arange(LANES)[None, :]
    s_mat = jnp.where(sel, jnp.tile(w_flat, LANES)[:, None], 0.0).astype(jnp.float32)

    # Double-buffered x/out blocks + S (double-buffered) + generous headroom.
    vmem_bytes = 4 * (2 * (tr * width + tr * LANES) + 2 * width * LANES) + (8 << 20)

    out = pl.pallas_call(
        _linear_kernel,
        out_shape=jax.ShapeDtypeStruct((r, LANES), jnp.float32),
        grid=grid,
        in_specs=[
            pl.BlockSpec((tr, width), lambda i: (i, 0)),            # x tile
            pl.BlockSpec((width, LANES), lambda i: (0, 0)),         # S (constant block)
            pl.BlockSpec(memory_space=pltpu.MemorySpace.SMEM),      # bias scalar
        ],
        out_specs=pl.BlockSpec((tr, LANES), lambda i: (i, 0)),
        compiler_params=pltpu.CompilerParams(
            dimension_semantics=("parallel",),
            vmem_limit_bytes=vmem_bytes,
        ),
    )(xr, s_mat, b_flat)

    y = out.reshape(-1)                # FREE reshape back to (n_pad,)
    if n_pad != n:
        y = y[:n]
    return y[:, None]                  # PyTorch layout (N, 1)


def _ref_linear(x, weight, bias):
    # Exact f32 elementwise reference (no XLA matmul precision ambiguity).
    w = weight.reshape(-1)
    return x[:, 0:1] * w[0] + x[:, 1:2] * w[1] + x[:, 2:3] * w[2] + bias.reshape(1, 1)


if __name__ == "__main__":
    key = jax.random.PRNGKey(0)
    kx, kw, kb = jax.random.split(key, 3)

    # Small deterministic inputs consistent with the module: in_features = 3.
    # N = 300 deliberately not a multiple of 128 to exercise the pad/slice path.
    n = 300
    x = jax.random.normal(kx, (n, 3), dtype=jnp.float32)

    # nn.Linear default init: U(-1/sqrt(fan_in), 1/sqrt(fan_in)), fan_in = 3.
    bound = 1.0 / jnp.sqrt(3.0)
    weight = jax.random.uniform(kw, (1, 3), jnp.float32, -bound, bound)
    bias = jax.random.uniform(kb, (1,), jnp.float32, -bound, bound)

    out = output_layer_nos(x, weight, bias)
    out = jax.block_until_ready(out)

    expected = _ref_linear(x, weight, bias)
    assert out.shape == (n, 1), out.shape
    assert jnp.allclose(out, expected, atol=1e-5, rtol=1e-5), (out, expected)

    print("KERNEL_OK")
</pallas_src>

<mosaic_0001>
module attributes {stable_mosaic.version = 11 : i64} {
  func.func @_linear_kernel(%arg0: i32, %arg1: memref<8x384xf32, #tpu.memory_space<vmem>>, %arg2: memref<384x128xf32, #tpu.memory_space<vmem>>, %arg3: memref<1xf32, #tpu.memory_space<smem>>, %arg4: memref<8x128xf32, #tpu.memory_space<vmem>>) attributes {dimension_semantics = [#tpu.dimension_semantics<parallel>], iteration_bounds = array<i64: 1>, scalar_prefetch = 0 : i64, scratch_operands = 0 : i64, tpu.core_type = #tpu.core_type<tc>, window_params = [{transform_indices = @transform_0, window_bounds = array<i64: 8, 384>}, {pipeline_mode = #tpu.pipeline_mode<synchronous>, transform_indices = @transform_1, window_bounds = array<i64: 384, 128>}, {transform_indices = @transform_2, window_bounds = array<i64: 1>}, {transform_indices = @transform_3, window_bounds = array<i64: 8, 128>}]} {
    %c0 = arith.constant 0 : index
    %c0_0 = arith.constant 0 : index
    %0 = vector.load %arg1[%c0, %c0_0] : memref<8x384xf32, #tpu.memory_space<vmem>>, vector<8x384xf32>
    %c0_1 = arith.constant 0 : index
    %c0_2 = arith.constant 0 : index
    %1 = vector.load %arg2[%c0_1, %c0_2] : memref<384x128xf32, #tpu.memory_space<vmem>>, vector<384x128xf32>
    %cst = arith.constant dense<0.000000e+00> : vector<8x128xf32>
    %2 = tpu.matmul %0, %1, %cst {dimension_numbers = #tpu.dot_dimension_numbers<[1], [0], [0], [1], [0, 0, 1, 1], [], []>, precision = #tpu.contract_precision<fp32>} : vector<8x384xf32>, vector<384x128xf32>, vector<8x128xf32> -> vector<8x128xf32>
    %c0_3 = arith.constant 0 : index
    %3 = memref.load %arg3[%c0_3] : memref<1xf32, #tpu.memory_space<smem>>
    %4 = vector.broadcast %3 : f32 to vector<8x128xf32>
    %5 = arith.addf %2, %4 : vector<8x128xf32>
    %c0_4 = arith.constant 0 : index
    %c0_5 = arith.constant 0 : index
    %6 = vector.load %arg4[%c0_4, %c0_5] : memref<8x128xf32, #tpu.memory_space<vmem>>, vector<8x128xf32>
    tpu.vector_store %arg4[%c0_4, %c0_5], %5 {strides = array<i32>} : memref<8x128xf32, #tpu.memory_space<vmem>>, vector<8x128xf32>,
    return
  }
  func.func @transform_0(%arg0: i32) -> (i32, i32) {
    %c0_i32 = arith.constant 0 : i32
    %c0_i32_0 = arith.constant 0 : i32
    return %arg0, %c0_i32 : i32, i32
  }
  func.func @transform_1(%arg0: i32) -> (i32, i32) {
    %c0_i32 = arith.constant 0 : i32
    %c0_i32_0 = arith.constant 0 : i32
    %c0_i32_1 = arith.constant 0 : i32
    return %c0_i32, %c0_i32_0 : i32, i32
  }
  func.func @transform_2(%arg0: i32) -> i32 {
    %c0_i32 = arith.constant 0 : i32
    %c0_i32_0 = arith.constant 0 : i32
    return %c0_i32 : i32
  }
  func.func @transform_3(%arg0: i32) -> (i32, i32) {
    %c0_i32 = arith.constant 0 : i32
    %c0_i32_0 = arith.constant 0 : i32
    return %arg0, %c0_i32 : i32, i32
  }
}

</mosaic_0001>

<bundles_post_ra>
// kernel: tile.6
= control target key start
LH: loop header
LB: loop body
LE: loop exit
PB: predicated region body
PF: predicated region fallthrough
CT: control target
= control target key end

     0   :  { %s112_s0 = inlined_call_operand.vmem [shape: f32[3], index: 0, kind: input, shape index: {}]   ;;  %s113_s1 = inlined_call_operand.vmem [shape: f32[128,3], index: 1, kind: output, shape index: {}]  }
   0x1   :  { %v4_v0 = vld [vmem:[%s112_s0] ss:$0 sm:$0xff] }
   0x2   :  { %5 = vst [vmem:[%s113_s1] sm:$0xff] %v4_v0  ;;  %36 = vst [vmem:[%s113_s1 + $0x8] sm:$0xff] %v4_v0 }
   0x3   :  { %37 = vst [vmem:[%s113_s1 + $0x10] sm:$0xff] %v4_v0  ;;  %38 = vst [vmem:[%s113_s1 + $0x18] sm:$0xff] %v4_v0 }
   0x4   :  { %39 = vst [vmem:[%s113_s1 + $0x20] sm:$0xff] %v4_v0  ;;  %40 = vst [vmem:[%s113_s1 + $0x28] sm:$0xff] %v4_v0 }
   0x5   :  { %41 = vst [vmem:[%s113_s1 + $0x30] sm:$0xff] %v4_v0  ;;  %42 = vst [vmem:[%s113_s1 + $0x38] sm:$0xff] %v4_v0 }
   0x6   :  { %43 = vst [vmem:[%s113_s1 + $0x40] sm:$0xff] %v4_v0  ;;  %44 = vst [vmem:[%s113_s1 + $0x48] sm:$0xff] %v4_v0 }
   0x7   :  { %45 = vst [vmem:[%s113_s1 + $0x50] sm:$0xff] %v4_v0  ;;  %46 = vst [vmem:[%s113_s1 + $0x58] sm:$0xff] %v4_v0 }
   0x8   :  { %47 = vst [vmem:[%s113_s1 + $0x60] sm:$0xff] %v4_v0  ;;  %48 = vst [vmem:[%s113_s1 + $0x68] sm:$0xff] %v4_v0 }
   0x9   :  { %49 = vst [vmem:[%s113_s1 + $0x70] sm:$0xff] %v4_v0  ;;  %50 = vst [vmem:[%s113_s1 + $0x78] sm:$0xff] %v4_v0 }

// kernel: output_layer_nos.1
= control target key start
LH: loop header
LB: loop body
LE: loop exit
PB: predicated region body
PF: predicated region fallthrough
CT: control target
= control target key end

     0   :  { %vm2101_vm0 = vmmov 0   ;;  %s3246_s1 = inlined_call_operand.vmem [shape: f32[384,128], index: 1, kind: input, shape index: {}]   ;;  %s3247_s0 = inlined_call_operand.vmem [shape: f32[8,384], index: 0, kind: input, shape index: {}]   ;;  %s3248_s2 = inlined_call_operand.<no memory space> [shape: f32[1], index: 2, kind: input, shape index: {}]   ;;  %s3249_s3 = inlined_call_operand.vmem [shape: f32[8,128], index: 3, kind: output, shape index: {}]  }
   0x1   :  { %v49_v0 = vld [vmem:[%s3246_s1 + $0xf8] sm:$0xff]  ;;  %v48_v2 = vld [vmem:[%s3246_s1 + $0xf0] sm:$0xff]  ;;  %v47_v7 = vld [vmem:[%s3246_s1 + $0xe8] sm:$0xff] }
   0x2   :  { %v33_v1 = vld [vmem:[%s3246_s1 + $0x78] sm:$0xff]  ;;  %v2131_v3 = vand.u32 4294901760, %v49_v0  ;;  %v2135_v5 = vand.u32 4294901760, %v48_v2  ;;  %v32_v6 = vld [vmem:[%s3246_s1 + $0x70] sm:$0xff]  ;;  %v31_v8 = vld [vmem:[%s3246_s1 + $0x68] sm:$0xff]  ;;  %v2148_v10 = vand.u32 4294901760, %v47_v7 }
   0x3   :  { %v2133_v4 = vand.u32 4294901760, %v33_v1  ;;  %v2146_v9 = vand.u32 4294901760, %v32_v6  ;;  %v2150_v11 = vand.u32 4294901760, %v31_v8  ;;  %v46_v12 = vld [vmem:[%s3246_s1 + $0xe0] sm:$0xff]  ;;  %v45_v14 = vld [vmem:[%s3246_s1 + $0xd8] sm:$0xff]  ;;  %v2179_v20 = vld [vmem:[%s3246_s1 + $0xd0] sm:$0xff] }
   0x4   :  { %v30_v13 = vld [vmem:[%s3246_s1 + $0x60] sm:$0xff]  ;;  %1576 = vmatprep.subr.mxu0 %v2131_v3  ;;  %v2162_v15 = vand.u32 4294901760, %v46_v12  ;;  %v2166_v17 = vand.u32 4294901760, %v45_v14  ;;  %v2169_v18 = vsub.f32 %v49_v0, %v2131_v3  ;;  %v2174_v19 = vld [vmem:[%s3246_s1 + $0x58] sm:$0xff]  ;;  %v2184_v21 = vld [vmem:[%s3246_s1 + $0x50] sm:$0xff]  ;;  %v2194_v24 = vand.u32 4294901760, %v2179_v20 }
   0x5   :  { %v2164_v16 = vand.u32 4294901760, %v30_v13  ;;  %1577 = vmatpush3.msra.mxu0 %v2133_v4  ;;  %v2188_v22 = vand.u32 4294901760, %v2174_v19  ;;  %v2191_v23 = vsub.f32 %v33_v1, %v2133_v4  ;;  %v2197_v25 = vsub.f32 %v48_v2, %v2135_v5  ;;  %v2202_v26 = vld [vmem:[%s3246_s1 + $0xc8] sm:$0xff]  ;;  %v2212_v28 = vld [vmem:[%s3246_s1 + $0xc0] sm:$0xff]  ;;  %v2264_v46 = vld [vmem:[%s3246_s1 + $0xb8] sm:$0xff] }
   0x6   :  { %v2207_v27 = vld [vmem:[%s3246_s1 + $0x48] sm:$0xff]  ;;  %1578 = vmatprep.subr.mxu0 %v2135_v5  ;;  %v3263_v29 = vand.u32 4294901760, %v2169_v18  ;;  %v2217_v30 = vand.u32 4294901760, %v2184_v21  ;;  %v2220_v31 = vsub.f32 %v32_v6, %v2146_v9  ;;  %v2223_v32 = vand.u32 4294901760, %v2202_v26  ;;  %v2237_v37 = vld [vmem:[%s3246_s1 + $0x40] sm:$0xff]  ;;  %v2277_v51 = vld [vmem:[%s3246_s1 + $0x38] sm:$0xff] }
   0x7   :  { %1579 = vmatpush3.msra.mxu0 %v2146_v9  ;;  %v3262_v33 = vand.u32 4294901760, %v2191_v23  ;;  %v3260_v34 = vand.u32 4294901760, %v2197_v25  ;;  %v2229_v35 = vsub.f32 %v47_v7, %v2148_v10  ;;  %v2232_v36 = vand.u32 4294901760, %v2207_v27  ;;  %v2287_v56 = vld [vmem:[%s3246_s1 + $0xb0] sm:$0xff]  ;;  %v2317_v2 = vld [vmem:[%s3246_s1 + $0xa8] sm:$0xff] }
   0x8   :  { %3320 = vst [vmem:[#allocation3_spill] sm:$0xff] %v2217_v30  ;;  %3321 = vst [vmem:[#allocation4_spill] sm:$0xff] %v2223_v32  ;;  %1580 = vmatprep.subr.mxu0 %v2148_v10  ;;  %v296_v38 = vsub.f32 %v2169_v18, %v3263_v29  ;;  %v3259_v39 = vand.u32 4294901760, %v2220_v31  ;;  %v2245_v40 = vsub.f32 %v31_v8, %v2150_v11  ;;  %v2248_v41 = vand.u32 4294901760, %v2212_v28  ;;  %v2302_v61 = vld [vmem:[%s3246_s1 + $0x30] sm:$0xff] }
   0x9   :  { %3322 = vst [vmem:[#allocation5_spill] sm:$0xff] %v2232_v36  ;;  %1581 = vmatpush3.msra.mxu0 %v2150_v11  ;;  %v184_v42 = vsub.f32 %v2191_v23, %v3262_v33  ;;  %v303_v43 = vsub.f32 %v2197_v25, %v3260_v34  ;;  %v3257_v44 = vand.u32 4294901760, %v2229_v35  ;;  %v2259_v45 = vsub.f32 %v46_v12, %v2162_v15  ;;  %v2453_v33 = vld [vmem:[%s3246_s1 + $0x88] sm:$0xff] }
   0xa   :  { %3323 = vst [vmem:[#allocation6_spill] sm:$0xff] %v2248_v41  ;;  %1582 = vmatprep.subr.mxu0 %v2162_v15  ;;  %v297_v47 = vand.u32 4294901760, %v296_v38  ;;  %v191_v48 = vsub.f32 %v2220_v31, %v3259_v39  ;;  %v3255_v49 = vand.u32 4294901760, %v2245_v40  ;;  %v2272_v50 = vand.u32 4294901760, %v2237_v37 }
   0xb   :  { %1583 = vmatpush3.msra.mxu0 %v2164_v16  ;;  %v185_v52 = vand.u32 4294901760, %v184_v42  ;;  %v304_v53 = vand.u32 4294901760, %v303_v43  ;;  %v310_v54 = vsub.f32 %v2229_v35, %v3257_v44  ;;  %v3254_v55 = vand.u32 4294901760, %v2259_v45  ;;  %v2426_v44 = vld [vmem:[%s3246_s1 + $0x90] sm:$0xff] }
   0xc   :  { %3324 = vst [vmem:[#allocation7_spill] sm:$0xff] %v2272_v50  ;;  %1584 = vmatprep.subr.mxu0 %v2166_v17  ;;  %1611 = vmatprep.subr.mxu1 %v297_v47  ;;  %v192_v57 = vand.u32 4294901760, %v191_v48  ;;  %v198_v58 = vsub.f32 %v2245_v40, %v3255_v49  ;;  %v2294_v59 = vsub.f32 %v30_v13, %v2164_v16  ;;  %v2297_v60 = vand.u32 4294901760, %v2264_v46  ;;  %v2331_v13 = vld [vmem:[%s3246_s1 + $0x28] sm:$0xff]  ;;  %v2410_v49 = vld [vmem:[%s3246_s1 + $0x18] sm:$0xff] }
   0xd   :  { %1585 = vmatpush3.msra.mxu0 %v2188_v22  ;;  %1612 = vmatpush3.msra.mxu1 %v185_v52  ;;  %v311_v62 = vand.u32 4294901760, %v310_v54  ;;  %v317_v63 = vsub.f32 %v2259_v45, %v3254_v55  ;;  %v2309_v0 = vsub.f32 %v45_v14, %v2166_v17  ;;  %v2312_v1 = vand.u32 4294901760, %v2277_v51 }
   0xe   :  { %3325 = vst [vmem:[#allocation8_spill] sm:$0xff] %v2297_v60  ;;  %1586 = vmatprep.subr.mxu0 %v2194_v24  ;;  %1613 = vmatprep.subr.mxu1 %v304_v53  ;;  %v199_v6 = vand.u32 4294901760, %v198_v58  ;;  %v3252_v7 = vand.u32 4294901760, %v2294_v59  ;;  %v2323_v8 = vsub.f32 %v2174_v19, %v2188_v22  ;;  %v2326_v12 = vand.u32 4294901760, %v2287_v56 }
   0xf   :  { %3326 = vst [vmem:[#allocation9_spill] sm:$0xff] %v2312_v1  ;;  %1587 = vmatpush3.msra.mxu0 %v2217_v30  ;;  %1614 = vmatpush3.msra.mxu1 %v192_v57  ;;  %v318_v14 = vand.u32 4294901760, %v317_v63  ;;  %v3250_v38 = vand.u32 4294901760, %v2309_v0  ;;  %v2337_v42 = vsub.f32 %v2179_v20, %v2194_v24  ;;  %v2340_v19 = vand.u32 4294901760, %v2302_v61  ;;  %v2357_v20 = vld [vmem:[%s3246_s1 + $0xa0] sm:$0xff] }
  0x10   :  { %3327 = vst [vmem:[#allocation10_spill] sm:$0xff] %v2326_v12  ;;  %1588 = vmatprep.subr.mxu0 %v2223_v32  ;;  %1615 = vmatprep.subr.mxu1 %v311_v62  ;;  %v205_v43 = vsub.f32 %v2294_v59, %v3252_v7  ;;  %v3251_v47 = vand.u32 4294901760, %v2323_v8  ;;  %v2349_v48 = vsub.f32 %v2184_v21, %v2217_v30  ;;  %v2352_v52 = vand.u32 4294901760, %v2317_v2 }
  0x11   :  { %3328 = vst [vmem:[#allocation11_spill] sm:$0xff] %v2340_v19  ;;  %1589 = vmatpush3.msra.mxu0 %v2232_v36  ;;  %1616 = vmatpush3.msra.mxu1 %v199_v6  ;;  %v324_v53 = vsub.f32 %v2309_v0, %v3250_v38  ;;  %v3253_v54 = vand.u32 4294901760, %v2337_v42  ;;  %v2366_v21 = vsub.f32 %v2202_v26, %v2223_v32  ;;  %v2369_v57 = vand.u32 4294901760, %v2331_v13  ;;  %v2383_v26 = vld [vmem:[%s3246_s1 + $0x20] sm:$0xff] }
  0x12   :  { %3329 = vst [vmem:[#allocation12_spill] sm:$0xff] %v2352_v52  ;;  %1590 = vmatprep.subr.mxu0 %v2248_v41  ;;  %1617 = vmatprep.subr.mxu1 %v318_v14  ;;  %v206_v58 = vand.u32 4294901760, %v205_v43  ;;  %v212_v62 = vsub.f32 %v2323_v8, %v3251_v47  ;;  %v3256_v63 = vand.u32 4294901760, %v2349_v48  ;;  %v2378_v6 = vsub.f32 %v2207_v27, %v2232_v36  ;;  %v2396_v27 = vld [vmem:[%s3246_s1 + $0x98] sm:$0xff] }
  0x13   :  { %3330 = vst [vmem:[#allocation13_spill] sm:$0xff] %v2369_v57  ;;  %1591 = vmatpush3.msra.mxu0 %v2272_v50  ;;  %v325_v38 = vand.u32 4294901760, %v324_v53  ;;  %v331_v14 = vsub.f32 %v2337_v42, %v3253_v54  ;;  %v3258_v43 = vand.u32 4294901760, %v2366_v21  ;;  %v2391_v47 = vand.u32 4294901760, %v2357_v20 }
  0x14   :  { %1618 = vmatpush3.msra.mxu1 %v206_v58  ;;  %1592 = vmatprep.subr.mxu0 %v2297_v60  ;;  %v213_v7 = vand.u32 4294901760, %v212_v62  ;;  %v219_v53 = vsub.f32 %v2349_v48, %v3256_v63  ;;  %v3261_v54 = vand.u32 4294901760, %v2378_v6  ;;  %v2405_v55 = vsub.f32 %v2212_v28, %v2248_v41 }
  0x15   :  { %3331 = vst [vmem:[#allocation14_spill] sm:$0xff] %v2391_v47  ;;  %1619 = vmatprep.subr.mxu1 %v325_v38  ;;  %1593 = vmatpush3.msra.mxu0 %v2312_v1  ;;  %v332_v58 = vand.u32 4294901760, %v331_v14  ;;  %v338_v62 = vsub.f32 %v2366_v21, %v3258_v43  ;;  %v2417_v63 = vand.u32 4294901760, %v2383_v26  ;;  %v2421_v28 = vsub.f32 %v2237_v37, %v2272_v50  ;;  %v2439_v37 = vld [vmem:[%s3246_s1 + $0x10] sm:$0xff] }
  0x16   :  { %1620 = vmatpush3.msra.mxu1 %v213_v7  ;;  %1594 = vmatprep.subr.mxu0 %v2326_v12  ;;  %v220_v38 = vand.u32 4294901760, %v219_v53  ;;  %v226_v14 = vsub.f32 %v2378_v6, %v3261_v54  ;;  %v3266_v43 = vand.u32 4294901760, %v2405_v55  ;;  %v2434_v39 = vand.u32 4294901760, %v2396_v27 }
  0x17   :  { %3332 = vst [vmem:[#allocation15_spill] sm:$0xff] %v2417_v63  ;;  %1621 = vmatprep.subr.mxu1 %v332_v58  ;;  %1595 = vmatpush3.msra.mxu0 %v2340_v19  ;;  %v339_v7 = vand.u32 4294901760, %v338_v62  ;;  %v3267_v53 = vand.u32 4294901760, %v2421_v28  ;;  %v2445_v34 = vsub.f32 %v2264_v46, %v2297_v60  ;;  %v2448_v54 = vand.u32 4294901760, %v2410_v49 }
  0x18   :  { %3333 = vst [vmem:[#allocation16_spill] sm:$0xff] %v2434_v39  ;;  %1622 = vmatpush3.msra.mxu1 %v220_v38  ;;  %1596 = vmatprep.subr.mxu0 %v2352_v52  ;;  %v227_v58 = vand.u32 4294901760, %v226_v14  ;;  %v345_v62 = vsub.f32 %v2405_v55, %v3266_v43  ;;  %v2461_v46 = vsub.f32 %v2277_v51, %v2312_v1  ;;  %v2464_v29 = vand.u32 4294901760, %v2426_v44  ;;  %v2481_v51 = vld [vmem:[%s3246_s1 + $0x8] sm:$0xff] }
  0x19   :  { %1623 = vmatprep.subr.mxu1 %v339_v7  ;;  %1597 = vmatpush3.msra.mxu0 %v2369_v57  ;;  %v233_v38 = vsub.f32 %v2421_v28, %v3267_v53  ;;  %v2473_v60 = vsub.f32 %v2287_v56, %v2326_v12  ;;  %v2476_v43 = vand.u32 4294901760, %v2439_v37  ;;  %v2487_v14 = vsub.f32 %v2302_v61, %v2340_v19  ;;  %v2495_v12 = vld [vmem:[%s3246_s1 + $0x80] sm:$0xff] }
  0x1a   :  { %1624 = vmatpush3.msra.mxu1 %v227_v58  ;;  %1598 = vmatprep.subr.mxu0 %v2391_v47  ;;  %v346_v7 = vand.u32 4294901760, %v345_v62  ;;  %v2490_v56 = vand.u32 4294901760, %v2453_v33  ;;  %v3335_v1 = vand.u32 4294901760, %v2445_v34  ;;  %v2504_v61 = vsub.f32 %v2317_v2, %v2352_v52  ;;  %v2521_v2 = vld [vmem:[%s3246_s1] sm:$0xff] }
  0x1b   :  { %1599 = vmatpush3.msra.mxu0 %v2417_v63  ;;  %v234_v58 = vand.u32 4294901760, %v233_v38  ;;  %v3284_v53 = vand.u32 4294901760, %v2473_v60  ;;  %v3337_v19 = vand.u32 4294901760, %v2461_v46  ;;  %v2512_v38 = vand.u32 4294901760, %v2481_v51 }
  0x1c   :  { %3334 = vst [vmem:[#allocation17_spill] sm:$0xff] %v2490_v56  ;;  %v352_v62 = vsub.f32 %v2445_v34, %v3335_v1  ;;  %3336 = vst [vmem:[#allocation18_spill] sm:$0xff] %v2504_v61  ;;  %1625 = vmatprep.subr.mxu1 %v346_v7  ;;  %1600 = vmatprep.subr.mxu0 %v2434_v39  ;;  %v2516_v1 = vsub.f32 %v2331_v13, %v2369_v57  ;;  %v2529_v52 = vand.u32 4294901760, %v2495_v12  ;;  %v16_v13 = vld [vmem:[%s3247_s0 + $0x8] sm:$0xff] }
  0x1d   :  { %v240_v50 = vsub.f32 %v2461_v46, %v3337_v19  ;;  %3338 = vst [vmem:[#allocation19_spill] sm:$0xff] %v2512_v38  ;;  %1626 = vmatpush3.msra.mxu1 %v234_v58  ;;  %1601 = vmatpush3.msra.mxu0 %v2448_v54  ;;  %v359_v19 = vsub.f32 %v2473_v60, %v3284_v53  ;;  %v3339_v58 = vand.u32 4294901760, %v2487_v14  ;;  %v3340_v32 = vand.u32 4294901760, %v2504_v61 }
  0x1e   :  { %v353_v7 = vand.u32 4294901760, %v352_v62  ;;  %1602 = vmatprep.subr.mxu0 %v2464_v29  ;;  %v3293_v36 = vand.u32 4294901760, %v2516_v1  ;;  %v2541_v53 = vsub.f32 %v2357_v20, %v2391_v47  ;;  %v2548_v30 = vand.u32 4294901760, %v2521_v2  ;;  %v15_v20 = vld [vmem:[%s3247_s0] sm:$0xff] }
  0x1f   :  { %v241_v57 = vand.u32 4294901760, %v240_v50  ;;  %v247_v62 = vsub.f32 %v2487_v14, %v3339_v58  ;;  %v360_v41 = vand.u32 4294901760, %v359_v19  ;;  %1603 = vmatpush3.msra.mxu0 %v2476_v43  ;;  %v366_v50 = vsub.f32 %v2504_v61, %v3340_v32 }
  0x20   :  { %1627 = vmatprep.subr.mxu1 %v353_v7  ;;  %v2552_v58 = vsub.f32 %v2383_v26, %v2417_v63  ;;  %1604 = vmatprep.subr.mxu0 %v2490_v56  ;;  %v254_v19 = vsub.f32 %v2516_v1, %v3293_v36  ;;  %v3296_v32 = vand.u32 4294901760, %v2541_v53  ;;  %v2562_v47 = vand.u32 4294901760, %v16_v13 }
  0x21   :  { %1628 = vmatpush3.msra.mxu1 %v241_v57  ;;  %v248_v7 = vand.u32 4294901760, %v247_v62  ;;  %v367_v61 = vand.u32 4294901760, %v366_v50  ;;  %1605 = vmatpush3.msra.mxu0 %v2512_v38  ;;  %v2568_v57 = vsub.f32 %v2396_v27, %v2434_v39 }
  0x22   :  { %3341 = vst [vmem:[#allocation20_spill] sm:$0xff] %v2562_v47  ;;  %1629 = vmatprep.subr.mxu1 %v360_v41  ;;  %v3297_v26 = vand.u32 4294901760, %v2552_v58  ;;  %v255_v62 = vand.u32 4294901760, %v254_v19  ;;  %1606 = vmatprep.subr.mxu0 %v2529_v52  ;;  %v373_v36 = vsub.f32 %v2541_v53, %v3296_v32  ;;  %v2575_v63 = vsub.f32 %v16_v13, %v2562_v47 }
  0x23   :  { %1630 = vmatpush3.msra.mxu1 %v248_v7  ;;  %v2577_v41 = vand.u32 4294901760, %v15_v20  ;;  %1607 = vmatpush3.msra.mxu0 %v2548_v30  ;;  %v3300_v50 = vand.u32 4294901760, %v2568_v57  ;;  %v2586_v7 = vsub.f32 %v2410_v49, %v2448_v54  ;;  %v2595_v32 = vsub.f32 %v2426_v44, %v2464_v29 }
  0x24   :  { %1631 = vmatprep.subr.mxu1 %v367_v61  ;;  %v261_v27 = vsub.f32 %v2552_v58, %v3297_v26  ;;  %v374_v19 = vand.u32 4294901760, %v373_v36  ;;  %v3303_v13 = vand.u32 4294901760, %v2575_v63  ;;  %1646 = vmatprep.subr.mxu0 %v2169_v18  ;;  %v2603_v36 = vsub.f32 %v2439_v37, %v2476_v43 }
  0x25   :  { %3342 = vst [vmem:[#allocation21_spill] sm:$0xff] %v2577_v41  ;;  %1632 = vmatpush3.msra.mxu1 %v255_v62  ;;  %v2591_v61 = vsub.f32 %v15_v20, %v2577_v41  ;;  %v380_v39 = vsub.f32 %v2568_v57, %v3300_v50  ;;  %v3306_v49 = vand.u32 4294901760, %v2586_v7  ;;  %405 = vmatprep.mubr.f32.mxu1 %v2562_v47 }
  0x26   :  { %v262_v26 = vand.u32 4294901760, %v261_v27  ;;  %1633 = vmatprep.subr.mxu1 %v374_v19  ;;  %v167_v20 = vsub.f32 %v2575_v63, %v3303_v13  ;;  %v2613_v27 = vsub.f32 %v2453_v33, %v2490_v56  ;;  %v3310_v19 = vand.u32 4294901760, %v2603_v36 }
  0x27   :  { %v3307_v44 = vand.u32 4294901760, %v2591_v61  ;;  %v381_v50 = vand.u32 4294901760, %v380_v39  ;;  %v268_v37 = vsub.f32 %v2586_v7, %v3306_v49  ;;  %v2621_v47 = vsub.f32 %v2481_v51, %v2512_v38 }
  0x28   :  { %3343 = vst [vmem:[#allocation22_spill] sm:$0xff] %v2613_v27  ;;  %1634 = vmatpush3.msra.mxu1 %v262_v26  ;;  %v168_v13 = vand.u32 4294901760, %v167_v20  ;;  %v3345_v33 = vand.u32 4294901760, %v2595_v32  ;;  %v3314_v39 = vand.u32 4294901760, %v2613_v27  ;;  %v275_v49 = vsub.f32 %v2603_v36, %v3310_v19 }
  0x29   :  { %3344 = vst [vmem:[#allocation23_spill] sm:$0xff] %v2621_v47  ;;  %v173_v62 = vsub.f32 %v2591_v61, %v3307_v44  ;;  %1635 = vmatprep.subr.mxu1 %v381_v50  ;;  %v269_v56 = vand.u32 4294901760, %v268_v37  ;;  %v3313_v51 = vand.u32 4294901760, %v2621_v47  ;;  %v2636_v20 = vsub.f32 %v2495_v12, %v2529_v52 }
  0x2a   :  { %v387_v26 = vsub.f32 %v2595_v32, %v3345_v33  ;;  %169 = vmatprep.mubr.f32.mxu0 %v168_v13  ;;  %v394_v33 = vsub.f32 %v2613_v27, %v3314_v39  ;;  %v2643_v50 = vsub.f32 %v2521_v2, %v2548_v30  ;;  %v276_v37 = vand.u32 4294901760, %v275_v49  ;;  %v3360_v39 = vld [vmem:[#allocation15_spill] sm:$0xff] }
  0x2b   :  { %v174_v44 = vand.u32 4294901760, %v173_v62  ;;  %1636 = vmatpush3.msra.mxu1 %v269_v56  ;;  %v282_v19 = vsub.f32 %v2621_v47, %v3313_v51  ;;  %v3312_v12 = vand.u32 4294901760, %v2636_v20  ;;  %v3359_v51 = vld [vmem:[#allocation14_spill] sm:$0xff] }
  0x2c   :  { %v388_v38 = vand.u32 4294901760, %v387_v26  ;;  %3346 = vst [vmem:[#allocation24_spill] sm:$0xff] %v2643_v50  ;;  %v395_v13 = vand.u32 4294901760, %v394_v33  ;;  %v3311_v62 = vand.u32 4294901760, %v2643_v50  ;;  %v3349_v33 = vld [vmem:[#allocation4_spill] sm:$0xff] }
  0x2d   :  { %175 = vmatmul.mubr.f32.vlgmr.msra.gmra.mxu0 %v174_v44  ;;  %v283_v26 = vand.u32 4294901760, %v282_v19  ;;  %v401_v56 = vsub.f32 %v2636_v20, %v3312_v12  ;;  %v3347_v44 = vld [vmem:[#allocation3_spill] sm:$0xff]  ;;  %v3348_v19 = vld [vmem:[#allocation18_spill] sm:$0xff]  ;;  %v3358_v12 = vld [vmem:[#allocation13_spill] sm:$0xff] }
  0x2e   :  { %1637 = vmatprep.subr.mxu1 %v388_v38  ;;  %1647 = vmatpush3.msra.mxu0 %v2191_v23  ;;  %v289_v2 = vsub.f32 %v2643_v50, %v3311_v62  ;;  %v3357_v62 = vld [vmem:[#allocation12_spill] sm:$0xff] }
  0x2f   :  { %1638 = vmatpush3.msra.mxu1 %v276_v37  ;;  %1648 = vmatprep.subr.mxu0 %v2197_v25  ;;  %v402_v38 = vand.u32 4294901760, %v401_v56  ;;  %v3350_v37 = vld [vmem:[#allocation5_spill] sm:$0xff]  ;;  %v3353_v56 = vld [vmem:[#allocation8_spill] sm:$0xff] }
  0x30   :  { %1639 = vmatprep.subr.mxu1 %v395_v13  ;;  %1649 = vmatpush3.msra.mxu0 %v2220_v31  ;;  %v290_v49 = vand.u32 4294901760, %v289_v2  ;;  %v3351_v13 = vld [vmem:[#allocation6_spill] sm:$0xff]  ;;  %v3354_v2 = vld [vmem:[#allocation9_spill] sm:$0xff] }
  0x31   :  { %1640 = vmatpush3.msra.mxu1 %v283_v26  ;;  %1650 = vmatprep.subr.mxu0 %v2229_v35  ;;  %v3352_v26 = vld [vmem:[#allocation7_spill] sm:$0xff] }
  0x32   :  { %542 = vmatprep.mubr.f32.mxu0 %v2575_v63  ;;  %1651 = vmatpush3.msra.mxu0 %v2245_v40 }
  0x33   :  { %1641 = vmatprep.subr.mxu1 %v402_v38  ;;  %1652 = vmatprep.subr.mxu0 %v2259_v45  ;;  %v3355_v38 = vld [vmem:[#allocation10_spill] sm:$0xff] }
  0x34   :  { %1642 = vmatpush3.msra.mxu1 %v290_v49  ;;  %1653 = vmatpush3.msra.mxu0 %v2294_v59  ;;  %v3356_v49 = vld [vmem:[#allocation11_spill] sm:$0xff] }
  0x35   :  { %407 = vmatmul.mubr.f32.vlgmr.msra.gmra.mxu1 %v2577_v41  ;;  %1654 = vmatprep.subr.mxu0 %v2309_v0  ;;  %v3361_v41 = vld [vmem:[#allocation16_spill] sm:$0xff] }
  0x36   :  { %1681 = vmatprep.subr.mxu1 %v2131_v3  ;;  %1655 = vmatpush3.msra.mxu0 %v2323_v8 }
  0x37   :  { %1682 = vmatpush3.msra.mxu1 %v2133_v4  ;;  %1656 = vmatprep.subr.mxu0 %v2337_v42 }
  0x38   :  { %1683 = vmatprep.subr.mxu1 %v2135_v5  ;;  %1657 = vmatpush3.msra.mxu0 %v2349_v48 }
  0x39   :  { %1684 = vmatpush3.msra.mxu1 %v2146_v9  ;;  %1658 = vmatprep.subr.mxu0 %v2366_v21 }
  0x3a   :  { %1685 = vmatprep.subr.mxu1 %v2148_v10  ;;  %1659 = vmatpush3.msra.mxu0 %v2378_v6 }
  0x3b   :  { %1686 = vmatpush3.msra.mxu1 %v2150_v11  ;;  %1660 = vmatprep.subr.mxu0 %v2405_v55 }
  0x3c   :  { %1687 = vmatprep.subr.mxu1 %v2162_v15  ;;  %1661 = vmatpush3.msra.mxu0 %v2421_v28 }
  0x3d   :  { %1688 = vmatpush3.msra.mxu1 %v2164_v16  ;;  %1662 = vmatprep.subr.mxu0 %v2445_v34 }
  0x3e   :  { %1689 = vmatprep.subr.mxu1 %v2166_v17  ;;  %1663 = vmatpush3.msra.mxu0 %v2461_v46 }
  0x3f   :  { %1690 = vmatpush3.msra.mxu1 %v2188_v22  ;;  %1664 = vmatprep.subr.mxu0 %v2473_v60 }
  0x40   :  { %1691 = vmatprep.subr.mxu1 %v2194_v24  ;;  %1665 = vmatpush3.msra.mxu0 %v2487_v14 }
  0x41   :  { %1692 = vmatpush3.msra.mxu1 %v3347_v44  ;;  %1666 = vmatprep.subr.mxu0 %v3348_v19 }
  0x42   :  { %1693 = vmatprep.subr.mxu1 %v3349_v33  ;;  %1667 = vmatpush3.msra.mxu0 %v2516_v1 }
  0x43   :  { %1694 = vmatpush3.msra.mxu1 %v3350_v37  ;;  %1668 = vmatprep.subr.mxu0 %v2541_v53 }
  0x44   :  { %1695 = vmatprep.subr.mxu1 %v3351_v13  ;;  %1669 = vmatpush3.msra.mxu0 %v2552_v58 }
  0x45   :  { %1696 = vmatpush3.msra.mxu1 %v3352_v26  ;;  %1670 = vmatprep.subr.mxu0 %v2568_v57 }
  0x46   :  { %1697 = vmatprep.subr.mxu1 %v3353_v56  ;;  %1671 = vmatpush3.msra.mxu0 %v2586_v7 }
  0x47   :  { %1698 = vmatpush3.msra.mxu1 %v3354_v2  ;;  %1672 = vmatprep.subr.mxu0 %v2595_v32 }
  0x48   :  { %1699 = vmatprep.subr.mxu1 %v3355_v38  ;;  %1673 = vmatpush3.msra.mxu0 %v2603_v36 }
  0x49   :  { %1700 = vmatpush3.msra.mxu1 %v3356_v49  ;;  %1674 = vmatprep.subr.mxu0 %v2613_v27  ;;  %v3362_v27 = vand.u32 4294901760, %v2169_v18  ;;  %v3367_v18 = vand.u32 4294901760, %v2229_v35  ;;  %v3373_v35 = vand.u32 4294901760, %v2591_v61 }
  0x4a   :  { %1701 = vmatprep.subr.mxu1 %v3357_v62  ;;  %1675 = vmatpush3.msra.mxu0 %v2621_v47  ;;  %v3363_v47 = vand.u32 4294901760, %v2191_v23  ;;  %v3369_v23 = vand.u32 4294901760, %v2245_v40  ;;  %v3375_v40 = vand.u32 4294901760, %v2323_v8 }
  0x4b   :  { %1702 = vmatpush3.msra.mxu1 %v3358_v12  ;;  %1676 = vmatprep.subr.mxu0 %v2636_v20 }
  0x4c   :  { %1703 = vmatprep.subr.mxu1 %v3359_v51  ;;  %1677 = vmatpush3.msra.mxu0 %v2643_v50  ;;  %v3364_v51 = vand.u32 4294901760, %v2197_v25  ;;  %v3366_v50 = vld [vmem:[#allocation17_spill] sm:$0xff]  ;;  %v3370_v25 = vand.u32 4294901760, %v2259_v45  ;;  %v3376_v45 = vand.u32 4294901760, %v2337_v42  ;;  %v3391_v42 = vand.u32 4294901760, %v2586_v7 }
  0x4d   :  { %1704 = vmatpush3.msra.mxu1 %v3360_v39  ;;  %545 = vmatmul.mubr.f32.vlgmr.msra.gmra.mxu0 %v2591_v61  ;;  %v3365_v39 = vand.u32 4294901760, %v2220_v31  ;;  %v3371_v31 = vand.u32 4294901760, %v2575_v63  ;;  %v3398_v7 = vand.u32 4294901760, %v2636_v20 }
  0x4e   :  { %1705 = vmatprep.subr.mxu1 %v3361_v41  ;;  %1716 = vmatprep.subr.mxu0 %v3362_v27  ;;  %v3368_v27 = vld [vmem:[#allocation19_spill] sm:$0xff] }
  0x4f   :  { %1706 = vmatpush3.msra.mxu1 %v2448_v54  ;;  %1717 = vmatpush3.msra.mxu0 %v3363_v47  ;;  %v3372_v47 = vand.u32 4294901760, %v2294_v59  ;;  %v3377_v59 = vand.u32 4294901760, %v2349_v48  ;;  %v63_v48 = vld [vmem:[%s3246_s1 + $0x168] sm:$0xff] }
  0x50   :  { %1707 = vmatprep.subr.mxu1 %v2464_v29  ;;  %1718 = vmatprep.subr.mxu0 %v3364_v51  ;;  %v3399_v51 = vld [vmem:[#allocation14_spill] sm:$0xff] }
  0x51   :  { %1708 = vmatpush3.msra.mxu1 %v2476_v43  ;;  %1719 = vmatpush3.msra.mxu0 %v3365_v39  ;;  %v3374_v39 = vand.u32 4294901760, %v2309_v0  ;;  %v3378_v0 = vand.u32 4294901760, %v2366_v21  ;;  %v3392_v21 = vand.u32 4294901760, %v2595_v32 }
  0x52   :  { %1709 = vmatprep.subr.mxu1 %v3366_v50  ;;  %1720 = vmatprep.subr.mxu0 %v3367_v18 }
  0x53   :  { %1710 = vmatpush3.msra.mxu1 %v3368_v27  ;;  %1721 = vmatpush3.msra.mxu0 %v3369_v23  ;;  %v58_v23 = vld [vmem:[%s3246_s1 + $0x140] sm:$0xff] }
  0x54   :  { %1711 = vmatprep.subr.mxu1 %v2529_v52  ;;  %1722 = vmatprep.subr.mxu0 %v3370_v25 }
  0x55   :  { %1712 = vmatpush3.msra.mxu1 %v2548_v30  ;;  %649 = vmatprep.mubr.f32.mxu1 %v3371_v31 }
  0x56   :  { %1723 = vmatpush3.msra.mxu0 %v3372_v47  ;;  %653 = vmatmul.mubr.f32.vlgmr.msra.gmra.mxu1 %v3373_v35  ;;  %v57_v47 = vld [vmem:[%s3246_s1 + $0x138] sm:$0xff] }
  0x57   :  { %1724 = vmatprep.subr.mxu0 %v3374_v39  ;;  %1751 = vmatprep.subr.mxu1 %v2131_v3  ;;  %v3379_v3 = vand.u32 4294901760, %v2378_v6  ;;  %v3393_v6 = vand.u32 4294901760, %v2603_v36 }
  0x58   :  { %1725 = vmatpush3.msra.mxu0 %v3375_v40  ;;  %1752 = vmatpush3.msra.mxu1 %v2133_v4  ;;  %v3380_v4 = vand.u32 4294901760, %v2405_v55  ;;  %v64_v55 = vld [vmem:[%s3246_s1 + $0x170] sm:$0xff] }
  0x59   :  { %1726 = vmatprep.subr.mxu0 %v3376_v45  ;;  %1753 = vmatprep.subr.mxu1 %v2135_v5  ;;  %v3381_v5 = vand.u32 4294901760, %v2421_v28  ;;  %v2809_v63 = vand.u32 4294901760, %v64_v55  ;;  %v62_v28 = vld [vmem:[%s3246_s1 + $0x160] sm:$0xff] }
  0x5a   :  { %1727 = vmatpush3.msra.mxu0 %v3377_v59  ;;  %1754 = vmatpush3.msra.mxu1 %v2146_v9  ;;  %v3382_v9 = vand.u32 4294901760, %v2445_v34  ;;  %v3389_v34 = vand.u32 4294901760, %v2552_v58  ;;  %v3396_v58 = vld [vmem:[#allocation23_spill] sm:$0xff]  ;;  %v2837_v36 = vand.u32 4294901760, %v62_v28  ;;  %v2911_v59 = vand.u32 4294901760, %v57_v47 }
  0x5b   :  { %1728 = vmatprep.subr.mxu0 %v3378_v0  ;;  %1755 = vmatprep.subr.mxu1 %v2148_v10  ;;  %v3383_v10 = vand.u32 4294901760, %v2461_v46  ;;  %v3397_v32 = vand.u32 4294901760, %v3396_v58  ;;  %v2835_v61 = vsub.f32 %v64_v55, %v2809_v63  ;;  %v53_v55 = vld [vmem:[%s3246_s1 + $0x118] sm:$0xff] }
  0x5c   :  { %1729 = vmatpush3.msra.mxu0 %v3379_v3  ;;  %1756 = vmatpush3.msra.mxu1 %v2150_v11  ;;  %v3384_v11 = vand.u32 4294901760, %v2473_v60  ;;  %v3390_v60 = vand.u32 4294901760, %v2568_v57  ;;  %v61_v57 = vld [vmem:[%s3246_s1 + $0x158] sm:$0xff] }
  0x5d   :  { %1730 = vmatprep.subr.mxu0 %v3380_v4  ;;  %1757 = vmatprep.subr.mxu1 %v2162_v15  ;;  %v3385_v15 = vand.u32 4294901760, %v2487_v14  ;;  %v1031_v18 = vand.u32 4294901760, %v2835_v61 }
  0x5e   :  { %1731 = vmatpush3.msra.mxu0 %v3381_v5  ;;  %1758 = vmatpush3.msra.mxu1 %v2164_v16  ;;  %v3386_v16 = vand.u32 4294901760, %v3348_v19  ;;  %v60_v19 = vld [vmem:[%s3246_s1 + $0x150] sm:$0xff] }
  0x5f   :  { %1732 = vmatprep.subr.mxu0 %v3382_v9  ;;  %1759 = vmatprep.subr.mxu1 %v2166_v17  ;;  %v3387_v17 = vand.u32 4294901760, %v2516_v1  ;;  %v2823_v1 = vand.u32 4294901760, %v63_v48  ;;  %v1032_v35 = vsub.f32 %v2835_v61, %v1031_v18 }
  0x60   :  { %1733 = vmatpush3.msra.mxu0 %v3383_v10  ;;  %1760 = vmatpush3.msra.mxu1 %v2188_v22  ;;  %v65_v22 = vld [vmem:[%s3246_s1 + $0x178] sm:$0xff] }
  0x61   :  { %1734 = vmatprep.subr.mxu0 %v3384_v11  ;;  %1761 = vmatprep.subr.mxu1 %v2194_v24  ;;  %v3388_v24 = vand.u32 4294901760, %v2541_v53  ;;  %v2798_v8 = vand.u32 4294901760, %v65_v22  ;;  %v3394_v53 = vld [vmem:[#allocation22_spill] sm:$0xff]  ;;  %v2848_v20 = vsub.f32 %v63_v48, %v2823_v1  ;;  %v1033_v3 = vand.u32 4294901760, %v1032_v35  ;;  %v54_v11 = vld [vmem:[%s3246_s1 + $0x120] sm:$0xff] }
  0x62   :  { %1735 = vmatpush3.msra.mxu0 %v3385_v15  ;;  %1762 = vmatpush3.msra.mxu1 %v3347_v44  ;;  %v3395_v46 = vand.u32 4294901760, %v3394_v53  ;;  %v17_v15 = vld [vmem:[%s3247_s0 + $0x10] sm:$0xff] }
  0x63   :  { %1736 = vmatprep.subr.mxu0 %v3386_v16  ;;  %1763 = vmatprep.subr.mxu1 %v3349_v33  ;;  %v2821_v14 = vsub.f32 %v65_v22, %v2798_v8  ;;  %v3402_v33 = vld [vmem:[#allocation20_spill] sm:$0xff]  ;;  %v1038_v31 = vand.u32 4294901760, %v2848_v20  ;;  %v52_v53 = vld [vmem:[%s3246_s1 + $0x110] sm:$0xff] }
  0x64   :  { %1737 = vmatpush3.msra.mxu0 %v3387_v17  ;;  %1764 = vmatpush3.msra.mxu1 %v3350_v37  ;;  %v2850_v37 = vand.u32 4294901760, %v61_v57  ;;  %v2941_v17 = vsub.f32 %v57_v47, %v2911_v59 }
  0x65   :  { %1738 = vmatprep.subr.mxu0 %v3388_v24  ;;  %1765 = vmatprep.subr.mxu1 %v3351_v13  ;;  %v1024_v13 = vand.u32 4294901760, %v2821_v14  ;;  %v1039_v45 = vsub.f32 %v2848_v20, %v1038_v31 }
  0x66   :  { %1739 = vmatpush3.msra.mxu0 %v3389_v34  ;;  %1766 = vmatpush3.msra.mxu1 %v3352_v26  ;;  %v59_v26 = vld [vmem:[%s3246_s1 + $0x148] sm:$0xff] }
  0x67   :  { %1740 = vmatprep.subr.mxu0 %v3390_v60  ;;  %1767 = vmatprep.subr.mxu1 %v3353_v56  ;;  %v3404_v56 = vld [vmem:[#allocation21_spill] sm:$0xff]  ;;  %v1025_v25 = vsub.f32 %v2821_v14, %v1024_v13  ;;  %v1040_v16 = vand.u32 4294901760, %v1039_v45 }
  0x68   :  { %1741 = vmatpush3.msra.mxu0 %v3391_v42  ;;  %1768 = vmatpush3.msra.mxu1 %v3354_v2  ;;  %v2100_v2 = vmov 0.0  }
  0x69   :  { %1742 = vmatprep.subr.mxu0 %v3392_v21  ;;  %1769 = vmatprep.subr.mxu1 %v3355_v38  ;;  %v2861_v38 = vsub.f32 %v62_v28, %v2837_v36  ;;  %v1026_v40 = vand.u32 4294901760, %v1025_v25  ;;  %v2961_v21 = vand.u32 4294901760, %v54_v11 }
  0x6a   :  { %1743 = vmatpush3.msra.mxu0 %v3393_v6  ;;  %1770 = vmatpush3.msra.mxu1 %v3356_v49  ;;  %v2863_v49 = vand.u32 4294901760, %v60_v19  ;;  %v2963_v6 = vand.u32 4294901760, %v17_v15 }
  0x6b   :  { %1744 = vmatprep.subr.mxu0 %v3395_v46  ;;  %1771 = vmatprep.subr.mxu1 %v3357_v62  ;;  %v3400_v62 = vld [vmem:[#allocation24_spill] sm:$0xff]  ;;  %v1045_v39 = vand.u32 4294901760, %v2861_v38 }
  0x6c   :  { %1745 = vmatpush3.msra.mxu0 %v3397_v32  ;;  %1772 = vmatpush3.msra.mxu1 %v3358_v12  ;;  %v3401_v44 = vand.u32 4294901760, %v3400_v62  ;;  %v3403_v12 = vld [vmem:[#allocation15_spill] sm:$0xff]  ;;  %v2977_v32 = vand.u32 4294901760, %v53_v55 }
  0x6d   :  { %1746 = vmatprep.subr.mxu0 %v3398_v7  ;;  %1773 = vmatprep.subr.mxu1 %v3399_v51  ;;  %v1046_v4 = vsub.f32 %v2861_v38, %v1045_v39  ;;  %v51_v51 = vld [vmem:[%s3246_s1 + $0x108] sm:$0xff] }
  0x6e   :  { %1747 = vmatpush3.msra.mxu0 %v3401_v44  ;;  %819 = vmatprep.mubr.f32.mxu0 %v3402_v33  ;;  %v2990_v44 = vsub.f32 %v54_v11, %v2961_v21  ;;  %v3010_v47 = vand.u32 4294901760, %v51_v51 }
  0x6f   :  { %1774 = vmatpush3.msra.mxu1 %v3403_v12  ;;  %821 = vmatmul.mubr.f32.vlgmr.msra.gmra.mxu0 %v3404_v56  ;;  %v1047_v60 = vand.u32 4294901760, %v1046_v4  ;;  %v2996_v12 = vsub.f32 %v17_v15, %v2963_v6 }
  0x70   :  { %1775 = vmatprep.subr.mxu1 %v3361_v41  ;;  %1888 = vmatprep.subr.mxu0 %v2100_v2  ;;  %v2871_v41 = vand.u32 4294901760, %v59_v26  ;;  %v3030_v15 = vsub.f32 %v51_v51, %v3010_v47 }
  0x71   :  { %1776 = vmatpush3.msra.mxu1 %v2448_v54  ;;  %1889 = vmatpush3.msra.mxu0 %v2798_v8  ;;  %v2876_v54 = vsub.f32 %v61_v57, %v2850_v37  ;;  %v1080_v57 = vand.u32 4294901760, %v2941_v17  ;;  %v1013_v4 = vand.u32 4294901760, %v2996_v12 }
  0x72   :  { %1777 = vmatprep.subr.mxu1 %v2464_v29  ;;  %1890 = vmatprep.subr.mxu0 %v2100_v2  ;;  %v2884_v29 = vand.u32 4294901760, %v58_v23  ;;  %v1122_v51 = vand.u32 4294901760, %v3030_v15 }
  0x73   :  { %1778 = vmatpush3.msra.mxu1 %v2476_v43  ;;  %1891 = vmatpush3.msra.mxu0 %v2809_v63  ;;  %v2892_v43 = vsub.f32 %v60_v19, %v2863_v49  ;;  %v2992_v19 = vand.u32 4294901760, %v52_v53  ;;  %v1081_v25 = vsub.f32 %v2941_v17, %v1080_v57 }
  0x74   :  { %1779 = vmatprep.subr.mxu1 %v3366_v50  ;;  %1892 = vmatprep.subr.mxu0 %v2100_v2  ;;  %v2901_v50 = vsub.f32 %v59_v26, %v2871_v41  ;;  %v2917_v0 = vsub.f32 %v58_v23, %v2884_v29  ;;  %v3005_v23 = vsub.f32 %v53_v55, %v2977_v32 }
  0x75   :  { %1780 = vmatpush3.msra.mxu1 %v3368_v27  ;;  %1893 = vmatpush3.msra.mxu0 %v2823_v1  ;;  %v56_v27 = vld [vmem:[%s3246_s1 + $0x130] sm:$0xff]  ;;  %v1059_v9 = vand.u32 4294901760, %v2892_v43  ;;  %v1082_v11 = vand.u32 4294901760, %v1081_v25 }
  0x76   :  { %1781 = vmatprep.subr.mxu1 %v2529_v52  ;;  %1894 = vmatprep.subr.mxu0 %v2100_v2  ;;  %v1052_v52 = vand.u32 4294901760, %v2876_v54  ;;  %v2927_v5 = vand.u32 4294901760, %v56_v27  ;;  %v1066_v10 = vand.u32 4294901760, %v2901_v50  ;;  %v1073_v34 = vand.u32 4294901760, %v2917_v0 }
  0x77   :  { %1782 = vmatpush3.msra.mxu1 %v2548_v30  ;;  %923 = vmatprep.mubr.f32.mxu1 %v3402_v33  ;;  %v55_v30 = vld [vmem:[%s3246_s1 + $0x128] sm:$0xff]  ;;  %v1060_v48 = vsub.f32 %v2892_v43, %v1059_v9 }
  0x78   :  { %1895 = vmatpush3.msra.mxu0 %v2837_v36  ;;  %925 = vmatmul.mubr.f32.vlgmr.msra.gmra.mxu1 %v3404_v56  ;;  %v1053_v22 = vsub.f32 %v2876_v54, %v1052_v52  ;;  %v2946_v24 = vand.u32 4294901760, %v55_v30  ;;  %v2956_v42 = vsub.f32 %v56_v27, %v2927_v5  ;;  %v1067_v28 = vsub.f32 %v2901_v50, %v1066_v10  ;;  %v50_v56 = vld [vmem:[%s3246_s1 + $0x100] sm:$0xff] }
  0x79   :  { %1896 = vmatprep.subr.mxu0 %v2100_v2  ;;  %1923 = vmatprep.subr.mxu1 %v2100_v2  ;;  %v1074_v7 = vsub.f32 %v2917_v0, %v1073_v34  ;;  %v1061_v62 = vand.u32 4294901760, %v1060_v48 }
  0x7a   :  { %1897 = vmatpush3.msra.mxu0 %v2850_v37  ;;  %1924 = vmatpush3.msra.mxu1 %v1026_v40  ;;  %v1054_v46 = vand.u32 4294901760, %v1053_v22  ;;  %v2975_v58 = vsub.f32 %v55_v30, %v2946_v24  ;;  %v1087_v33 = vand.u32 4294901760, %v2956_v42  ;;  %v1068_v26 = vand.u32 4294901760, %v1067_v28 }
  0x7b   :  { %1898 = vmatprep.subr.mxu0 %v2100_v2  ;;  %1925 = vmatprep.subr.mxu1 %v2100_v2  ;;  %v1075_v27 = vand.u32 4294901760, %v1074_v7  ;;  %v3017_v40 = vsub.f32 %v52_v53, %v2992_v19  ;;  %v3022_v30 = vand.u32 4294901760, %v50_v56  ;;  %v1108_v22 = vand.u32 4294901760, %v3005_v23 }
  0x7c   :  { %1899 = vmatpush3.msra.mxu0 %v2863_v49  ;;  %1926 = vmatpush3.msra.mxu1 %v1033_v3  ;;  %v1094_v35 = vand.u32 4294901760, %v2975_v58  ;;  %v1088_v45 = vsub.f32 %v2956_v42, %v1087_v33  ;;  %v1101_v3 = vand.u32 4294901760, %v2990_v44  ;;  %v1014_v53 = vsub.f32 %v2996_v12, %v1013_v4 }
  0x7d   :  { %1900 = vmatprep.subr.mxu0 %v2100_v2  ;;  %1927 = vmatprep.subr.mxu1 %v2100_v2  ;;  %v1115_v28 = vand.u32 4294901760, %v3017_v40  ;;  %v1109_v7 = vsub.f32 %v3005_v23, %v1108_v22 }
  0x7e   :  { %1901 = vmatpush3.msra.mxu0 %v2871_v41  ;;  %1928 = vmatpush3.msra.mxu1 %v1040_v16  ;;  %v1095_v16 = vsub.f32 %v2975_v58, %v1094_v35  ;;  %v1089_v55 = vand.u32 4294901760, %v1088_v45  ;;  %v1102_v48 = vsub.f32 %v2990_v44, %v1101_v3  ;;  %v1015_v25 = vand.u32 4294901760, %v1014_v53 }
  0x7f   :  { %1902 = vmatprep.subr.mxu0 %v2100_v2  ;;  %1929 = vmatprep.subr.mxu1 %v2100_v2  ;;  %v1123_v45 = vsub.f32 %v3030_v15, %v1122_v51 }
  0x80   :  { %1903 = vmatpush3.msra.mxu0 %v2884_v29  ;;  %1930 = vmatpush3.msra.mxu1 %v1047_v60  ;;  %v3040_v60 = vsub.f32 %v50_v56, %v3022_v30 }
  0x81   :  { %1904 = vmatprep.subr.mxu0 %v2100_v2  ;;  %1931 = vmatprep.subr.mxu1 %v2100_v2 }
  0x82   :  { %1905 = vmatpush3.msra.mxu0 %v2911_v59  ;;  %1932 = vmatpush3.msra.mxu1 %v1054_v46  ;;  %v1096_v46 = vand.u32 4294901760, %v1095_v16  ;;  %v1129_v56 = vand.u32 4294901760, %v3040_v60 }
  0x83   :  { %1906 = vmatprep.subr.mxu0 %v2100_v2  ;;  %1933 = vmatprep.subr.mxu1 %v2100_v2 }
  0x84   :  { %1907 = vmatpush3.msra.mxu0 %v2927_v5  ;;  %1934 = vmatpush3.msra.mxu1 %v1061_v62  ;;  %v1103_v62 = vand.u32 4294901760, %v1102_v48  ;;  %v1130_v16 = vsub.f32 %v3040_v60, %v1129_v56 }
  0x85   :  { %1908 = vmatprep.subr.mxu0 %v2100_v2  ;;  %1935 = vmatprep.subr.mxu1 %v2100_v2 }
  0x86   :  { %1909 = vmatpush3.msra.mxu0 %v2946_v24  ;;  %1936 = vmatpush3.msra.mxu1 %v1068_v26  ;;  %v1116_v26 = vsub.f32 %v3017_v40, %v1115_v28  ;;  %v1131_v48 = vand.u32 4294901760, %v1130_v16 }
  0x87   :  { %1910 = vmatprep.subr.mxu0 %v2100_v2  ;;  %1937 = vmatprep.subr.mxu1 %v2100_v2 }
  0x88   :  { %1911 = vmatpush3.msra.mxu0 %v2961_v21  ;;  %1938 = vmatpush3.msra.mxu1 %v1075_v27  ;;  %v1110_v27 = vand.u32 4294901760, %v1109_v7 }
  0x89   :  { %1912 = vmatprep.subr.mxu0 %v2100_v2  ;;  %1939 = vmatprep.subr.mxu1 %v2100_v2 }
  0x8a   :  { %1913 = vmatpush3.msra.mxu0 %v2977_v32  ;;  %1940 = vmatpush3.msra.mxu1 %v1082_v11  ;;  %v1117_v11 = vand.u32 4294901760, %v1116_v26 }
  0x8b   :  { %1914 = vmatprep.subr.mxu0 %v2100_v2  ;;  %1941 = vmatprep.subr.mxu1 %v2100_v2 }
  0x8c   :  { %1915 = vmatpush3.msra.mxu0 %v2992_v19  ;;  %1942 = vmatpush3.msra.mxu1 %v1089_v55  ;;  %v1124_v55 = vand.u32 4294901760, %v1123_v45 }
  0x8d   :  { %1916 = vmatprep.subr.mxu0 %v2100_v2  ;;  %1943 = vmatprep.subr.mxu1 %v2100_v2 }
  0x8e   :  { %1917 = vmatpush3.msra.mxu0 %v3010_v47  ;;  %1944 = vmatpush3.msra.mxu1 %v1096_v46 }
  0x8f   :  { %1918 = vmatprep.subr.mxu0 %v2100_v2  ;;  %1945 = vmatprep.subr.mxu1 %v2100_v2 }
  0x90   :  { %1919 = vmatpush3.msra.mxu0 %v3022_v30  ;;  %1920 = vmatprep.mubr.msk.f32.mxu0 %vm2101_vm0, %v2100_v2 }
  0x91   :  { %1946 = vmatpush3.msra.mxu1 %v1103_v62  ;;  %1921 = vmatmul.mubr.f32.vlgmr.msra.gmra.mxu0 %v1015_v25 }
  0x92   :  { %1947 = vmatprep.subr.mxu1 %v2100_v2  ;;  %1958 = vmatprep.subr.mxu0 %v2100_v2 }
  0x93   :  { %1948 = vmatpush3.msra.mxu1 %v1110_v27  ;;  %1959 = vmatpush3.msra.mxu0 %v2821_v14 }
  0x94   :  { %1949 = vmatprep.subr.mxu1 %v2100_v2  ;;  %1960 = vmatprep.subr.mxu0 %v2100_v2 }
  0x95   :  { %1950 = vmatpush3.msra.mxu1 %v1117_v11  ;;  %1961 = vmatpush3.msra.mxu0 %v2835_v61  ;;  %v67_v61 = vstv %s3248_s2 }
  0x96   :  { %1951 = vmatprep.subr.mxu1 %v2100_v2  ;;  %1962 = vmatprep.subr.mxu0 %v2100_v2 }
  0x97   :  { %1952 = vmatpush3.msra.mxu1 %v1124_v55  ;;  %1963 = vmatpush3.msra.mxu0 %v2848_v20 }
  0x98   :  { %1953 = vmatprep.subr.mxu1 %v2100_v2  ;;  %1964 = vmatprep.subr.mxu0 %v2100_v2 }
  0x99   :  { %1954 = vmatpush3.msra.mxu1 %v1131_v48  ;;  %1955 = vmatprep.mubr.msk.f32.mxu1 %vm2101_vm0, %v2100_v2 }
  0x9a   :  { %1965 = vmatpush3.msra.mxu0 %v2861_v38  ;;  %1956 = vmatmul.mubr.f32.vlgmr.msra.gmra.mxu1 %v2963_v6 }
  0x9b   :  { %1966 = vmatprep.subr.mxu0 %v2100_v2  ;;  %1993 = vmatprep.subr.mxu1 %v2100_v2 }
  0x9c   :  { %1967 = vmatpush3.msra.mxu0 %v2876_v54  ;;  %1994 = vmatpush3.msra.mxu1 %v2798_v8 }
  0x9d   :  { %1968 = vmatprep.subr.mxu0 %v2100_v2  ;;  %1995 = vmatprep.subr.mxu1 %v2100_v2 }
  0x9e   :  { %1969 = vmatpush3.msra.mxu0 %v2892_v43  ;;  %1996 = vmatpush3.msra.mxu1 %v2809_v63 }
  0x9f   :  { %1970 = vmatprep.subr.mxu0 %v2100_v2  ;;  %1997 = vmatprep.subr.mxu1 %v2100_v2 }
  0xa0   :  { %1971 = vmatpush3.msra.mxu0 %v2901_v50  ;;  %1998 = vmatpush3.msra.mxu1 %v2823_v1 }
  0xa1   :  { %1972 = vmatprep.subr.mxu0 %v2100_v2  ;;  %1999 = vmatprep.subr.mxu1 %v2100_v2 }
  0xa2   :  { %1973 = vmatpush3.msra.mxu0 %v2917_v0  ;;  %2000 = vmatpush3.msra.mxu1 %v2837_v36 }
  0xa3   :  { %1974 = vmatprep.subr.mxu0 %v2100_v2  ;;  %2001 = vmatprep.subr.mxu1 %v2100_v2 }
  0xa4   :  { %1975 = vmatpush3.msra.mxu0 %v2941_v17  ;;  %2002 = vmatpush3.msra.mxu1 %v2850_v37 }
  0xa5   :  { %1976 = vmatprep.subr.mxu0 %v2100_v2  ;;  %2003 = vmatprep.subr.mxu1 %v2100_v2 }
  0xa6   :  { %1977 = vmatpush3.msra.mxu0 %v2956_v42  ;;  %2004 = vmatpush3.msra.mxu1 %v2863_v49 }
  0xa7   :  { %1978 = vmatprep.subr.mxu0 %v2100_v2  ;;  %2005 = vmatprep.subr.mxu1 %v2100_v2 }
  0xa8   :  { %1979 = vmatpush3.msra.mxu0 %v2975_v58  ;;  %2006 = vmatpush3.msra.mxu1 %v2871_v41 }
  0xa9   :  { %1980 = vmatprep.subr.mxu0 %v2100_v2  ;;  %2007 = vmatprep.subr.mxu1 %v2100_v2 }
  0xaa   :  { %1981 = vmatpush3.msra.mxu0 %v2990_v44  ;;  %2008 = vmatpush3.msra.mxu1 %v2884_v29 }
  0xab   :  { %1982 = vmatprep.subr.mxu0 %v2100_v2  ;;  %2009 = vmatprep.subr.mxu1 %v2100_v2 }
  0xac   :  { %1983 = vmatpush3.msra.mxu0 %v3005_v23  ;;  %2010 = vmatpush3.msra.mxu1 %v2911_v59 }
  0xad   :  { %1984 = vmatprep.subr.mxu0 %v2100_v2  ;;  %2011 = vmatprep.subr.mxu1 %v2100_v2 }
  0xae   :  { %1985 = vmatpush3.msra.mxu0 %v3017_v40  ;;  %2012 = vmatpush3.msra.mxu1 %v2927_v5 }
  0xaf   :  { %1986 = vmatprep.subr.mxu0 %v2100_v2  ;;  %2013 = vmatprep.subr.mxu1 %v2100_v2 }
  0xb0   :  { %1987 = vmatpush3.msra.mxu0 %v3030_v15  ;;  %2014 = vmatpush3.msra.mxu1 %v2946_v24 }
  0xb1   :  { %1988 = vmatprep.subr.mxu0 %v2100_v2  ;;  %2015 = vmatprep.subr.mxu1 %v2100_v2 }
  0xb2   :  { %1989 = vmatpush3.msra.mxu0 %v3040_v60  ;;  %1990 = vmatprep.mubr.msk.f32.mxu0 %vm2101_vm0, %v2100_v2 }
  0xb3   :  { %2016 = vmatpush3.msra.mxu1 %v2961_v21  ;;  %1991 = vmatmul.mubr.f32.vlgmr.msra.gmra.mxu0 %v2996_v12 }
  0xb4   :  { %2017 = vmatprep.subr.mxu1 %v2100_v2  ;;  %2028 = vmatprep.subr.mxu0 %v2100_v2 }
  0xb5   :  { %2018 = vmatpush3.msra.mxu1 %v2977_v32  ;;  %2029 = vmatpush3.msra.mxu0 %v1024_v13 }
  0xb6   :  { %2019 = vmatprep.subr.mxu1 %v2100_v2  ;;  %2030 = vmatprep.subr.mxu0 %v2100_v2 }
  0xb7   :  { %2020 = vmatpush3.msra.mxu1 %v2992_v19  ;;  %2031 = vmatpush3.msra.mxu0 %v1031_v18 }
  0xb8   :  { %2021 = vmatprep.subr.mxu1 %v2100_v2  ;;  %2032 = vmatprep.subr.mxu0 %v2100_v2 }
  0xb9   :  { %2022 = vmatpush3.msra.mxu1 %v3010_v47  ;;  %2033 = vmatpush3.msra.mxu0 %v1038_v31 }
  0xba   :  { %2023 = vmatprep.subr.mxu1 %v2100_v2  ;;  %2034 = vmatprep.subr.mxu0 %v2100_v2 }
  0xbb   :  { %2024 = vmatpush3.msra.mxu1 %v3022_v30  ;;  %2025 = vmatprep.mubr.msk.f32.mxu1 %vm2101_vm0, %v2100_v2 }
  0xbc   :  { %2035 = vmatpush3.msra.mxu0 %v1045_v39  ;;  %2026 = vmatmul.mubr.f32.vlgmr.msra.gmra.mxu1 %v1013_v4 }
  0xbd   :  { %2036 = vmatprep.subr.mxu0 %v2100_v2  ;;  %2063 = vmatprep.subr.mxu1 %v2100_v2 }
  0xbe   :  { %2037 = vmatpush3.msra.mxu0 %v1052_v52  ;;  %2064 = vmatpush3.msra.mxu1 %v2798_v8 }
  0xbf   :  { %2038 = vmatprep.subr.mxu0 %v2100_v2  ;;  %2065 = vmatprep.subr.mxu1 %v2100_v2 }
  0xc0   :  { %2039 = vmatpush3.msra.mxu0 %v1059_v9  ;;  %2066 = vmatpush3.msra.mxu1 %v2809_v63 }
  0xc1   :  { %2040 = vmatprep.subr.mxu0 %v2100_v2  ;;  %2067 = vmatprep.subr.mxu1 %v2100_v2 }
  0xc2   :  { %2041 = vmatpush3.msra.mxu0 %v1066_v10  ;;  %2068 = vmatpush3.msra.mxu1 %v2823_v1 }
  0xc3   :  { %2042 = vmatprep.subr.mxu0 %v2100_v2  ;;  %2069 = vmatprep.subr.mxu1 %v2100_v2 }
  0xc4   :  { %2043 = vmatpush3.msra.mxu0 %v1073_v34  ;;  %2070 = vmatpush3.msra.mxu1 %v2837_v36 }
  0xc5   :  { %2044 = vmatprep.subr.mxu0 %v2100_v2  ;;  %2071 = vmatprep.subr.mxu1 %v2100_v2 }
  0xc6   :  { %2045 = vmatpush3.msra.mxu0 %v1080_v57  ;;  %2072 = vmatpush3.msra.mxu1 %v2850_v37 }
  0xc7   :  { %2046 = vmatprep.subr.mxu0 %v2100_v2  ;;  %2073 = vmatprep.subr.mxu1 %v2100_v2 }
  0xc8   :  { %2047 = vmatpush3.msra.mxu0 %v1087_v33  ;;  %2074 = vmatpush3.msra.mxu1 %v2863_v49 }
  0xc9   :  { %2048 = vmatprep.subr.mxu0 %v2100_v2  ;;  %2075 = vmatprep.subr.mxu1 %v2100_v2 }
  0xca   :  { %2049 = vmatpush3.msra.mxu0 %v1094_v35  ;;  %2076 = vmatpush3.msra.mxu1 %v2871_v41 }
  0xcb   :  { %2050 = vmatprep.subr.mxu0 %v2100_v2  ;;  %2077 = vmatprep.subr.mxu1 %v2100_v2 }
  0xcc   :  { %2051 = vmatpush3.msra.mxu0 %v1101_v3  ;;  %2078 = vmatpush3.msra.mxu1 %v2884_v29 }
  0xcd   :  { %2052 = vmatprep.subr.mxu0 %v2100_v2  ;;  %2079 = vmatprep.subr.mxu1 %v2100_v2 }
  0xce   :  { %2053 = vmatpush3.msra.mxu0 %v1108_v22  ;;  %2080 = vmatpush3.msra.mxu1 %v2911_v59 }
  0xcf   :  { %2054 = vmatprep.subr.mxu0 %v2100_v2  ;;  %2081 = vmatprep.subr.mxu1 %v2100_v2 }
  0xd0   :  { %2055 = vmatpush3.msra.mxu0 %v1115_v28  ;;  %2082 = vmatpush3.msra.mxu1 %v2927_v5 }
  0xd1   :  { %2056 = vmatprep.subr.mxu0 %v2100_v2  ;;  %2083 = vmatprep.subr.mxu1 %v2100_v2 }
  0xd2   :  { %2057 = vmatpush3.msra.mxu0 %v1122_v51  ;;  %2084 = vmatpush3.msra.mxu1 %v2946_v24 }
  0xd3   :  { %2058 = vmatprep.subr.mxu0 %v2100_v2  ;;  %2085 = vmatprep.subr.mxu1 %v2100_v2 }
  0xd4   :  { %2059 = vmatpush3.msra.mxu0 %v1129_v56  ;;  %2060 = vmatprep.mubr.msk.f32.mxu0 %vm2101_vm0, %v2100_v2 }
  0xd5   :  { %2086 = vmatpush3.msra.mxu1 %v2961_v21  ;;  %2061 = vmatmul.mubr.f32.vlgmr.msra.gmra.mxu0 %v2963_v6 }
  0xd6   :  { %2087 = vmatprep.subr.mxu1 %v2100_v2  ;;  %2095 = vmatprep.mubr.msk.f32.mxu1 %vm2101_vm0, %v2100_v2 }
  0xd7   :  { %2088 = vmatpush3.msra.mxu1 %v2977_v32 }
  0xd8   :  { %2089 = vmatprep.subr.mxu1 %v2100_v2 }
  0xd9   :  { %2090 = vmatpush3.msra.mxu1 %v2992_v19 }
  0xda   :  { %2091 = vmatprep.subr.mxu1 %v2100_v2 }
  0xdb   :  { %2092 = vmatpush3.msra.mxu1 %v3010_v47 }
  0xdc   :  { %2093 = vmatprep.subr.mxu1 %v2100_v2 }
  0xdd   :  { %2094 = vmatpush3.msra.mxu1 %v3022_v30 }
  0xde   :  { %2096 = vmatmul.mubr.f32.vlgmr.msra.gmra.mxu1 %v2963_v6 }
  0xed   :  { %v1608_v8 = vpop.f32.mrf.mxu0 }
  0xef   :  { %v1609_v63 = vpop.f32.mrf.mxu0 }
  0xf0   :  { %v1610_v1 = vadd.f32 %v1609_v63, %v1608_v8 }
  0xf2   :  { %v177_v20 = vadd.f32 %v1610_v1, %v67_v61 }
  0xf5   :  { %v1643_v14 = vpop.f32.mrf.mxu1 }
  0xf7   :  { %v1644_v36 = vpop.f32.mrf.mxu1 }
  0xf8   :  { %v1645_v37 = vadd.f32 %v1644_v36, %v1643_v14 }
  0xfa   :  { %v409_v49 = vadd.f32 %v1645_v37, %v177_v20 }
 0x10d   :  { %v1678_v13 = vpop.f32.mrf.mxu0 }
 0x10f   :  { %v1679_v38 = vpop.f32.mrf.mxu0 }
 0x110   :  { %v1680_v18 = vadd.f32 %v1679_v38, %v1678_v13 }
 0x112   :  { %v547_v2 = vadd.f32 %v1680_v18, %v409_v49 }
 0x116   :  { %v1713_v41 = vpop.f32.mrf.mxu1 }
 0x118   :  { %v1714_v54 = vpop.f32.mrf.mxu1 }
 0x119   :  { %v1715_v31 = vadd.f32 %v1714_v54, %v1713_v41 }
 0x11b   :  { %v655_v39 = vadd.f32 %v1715_v31, %v547_v2 }
 0x12f   :  { %v1748_v29 = vpop.f32.mrf.mxu0 }
 0x131   :  { %v1749_v43 = vpop.f32.mrf.mxu0 }
 0x132   :  { %v1750_v50 = vadd.f32 %v1749_v43, %v1748_v29 }
 0x134   :  { %v823_v59 = vadd.f32 %v1750_v50, %v655_v39 }
 0x138   :  { %v1783_v52 = vpop.f32.mrf.mxu1 }
 0x13a   :  { %v1784_v0 = vpop.f32.mrf.mxu1 }
 0x13b   :  { %v1785_v5 = vadd.f32 %v1784_v0, %v1783_v52 }
 0x13d   :  { %v927_v9 = vadd.f32 %v1785_v5, %v823_v59 }
 0x151   :  { %v1017_v10 = vpop.f32.mrf.mxu0 }
 0x152   :  { %v1018_v17 = vadd.f32 %v1017_v10, %v927_v9 }
 0x153   :  { %v1922_v24 = vpop.f32.mrf.mxu0 }
 0x15a   :  { %v1168_v34 = vpop.f32.mrf.mxu1 }
 0x15b   :  { %v1169_v44 = vadd.f32 %v1168_v34, %v1018_v17 }
 0x15c   :  { %v1957_v42 = vpop.f32.mrf.mxu1 }
 0x173   :  { %v1272_v21 = vpop.f32.mrf.mxu0 }
 0x174   :  { %v1273_v33 = vadd.f32 %v1272_v21, %v1169_v44 }
 0x175   :  { %v1992_v6 = vpop.f32.mrf.mxu0 }
 0x17c   :  { %v1361_v58 = vpop.f32.mrf.mxu1 }
 0x17d   :  { %v1362_v12 = vadd.f32 %v1361_v58, %v1273_v33 }
 0x17e   :  { %v2027_v32 = vpop.f32.mrf.mxu1 }
 0x195   :  { %v1480_v57 = vpop.f32.mrf.mxu0 }
 0x196   :  { %v1481_v23 = vadd.f32 %v1480_v57, %v1362_v12 }
 0x197   :  { %v2062_v19 = vpop.f32.mrf.mxu0 }
 0x19e   :  { %v1567_v47 = vpop.f32.mrf.mxu1 }
 0x19f   :  { %v1568_v35 = vadd.f32 %v1567_v47, %v1481_v23 }
 0x1a0   :  { %v2097_v40 = vpop.f32.mrf.mxu1 }
 0x1a1   :  { %1571 = vst [vmem:[%s3249_s3] sm:$0xff] %v1568_v35 }

</bundles_post_ra>
